<compile_context>
chip_gen: v6e
topology: v6e:2x2x1
jax: 0.10.0
libtpu: 0.0.40
codegen_flags: <defaults>
</compile_context>

<pallas_src>
import functools

import jax
import jax.numpy as jnp
from jax.experimental import pallas as pl
from jax.experimental.pallas import tpu as pltpu


def _round_up(x, m):
    return ((x + m - 1) // m) * m


@functools.lru_cache(maxsize=1)
def _vmem_capacity_bytes():
    """Per-TensorCore VMEM capacity (128 MiB on v5e/v6e, 64 MiB on v7x)."""
    try:
        cap = getattr(pltpu.get_tpu_info(), "vmem_capacity_bytes", None)
        if cap:
            return int(cap)
    except Exception:
        pass
    return 64 * 1024 * 1024  # conservative fallback (v7x per-TC VMEM)


def _choose_tiles(N, V, itemsize):
    """Pick (tile_m, tile_v, v_pad, sublane), generation-aware."""
    sublane = max(8, 32 // itemsize)            # 8 for f32, 16 for bf16, 32 for int8
    cap = _vmem_capacity_bytes()
    if cap >= 100 * 1024 * 1024:                # 128 MiB parts: v5e / v6e
        budget = 14 * 1024 * 1024               # bytes per logits buffer (x2 pipelined)
        max_tile_m = 1024
        small_vmem = False
    else:                                       # 64 MiB parts: v7x
        budget = 6 * 1024 * 1024
        max_tile_m = 512
        small_vmem = True

    # Class axis: always a 128-multiple tile (wide contiguous DMA strips); the wrapper
    # pads odd vocab sizes up with a large finite negative.
    v128 = _round_up(V, 128)
    tile_v = v128 if v128 <= 2048 else 2048
    v_pad = _round_up(V, tile_v)

    n_pad = _round_up(N, sublane)
    tile_m = (budget // (tile_v * itemsize)) // sublane * sublane
    tile_m = max(sublane, min(max_tile_m, tile_m, n_pad))
    if small_vmem:
        # v7x has 2 TensorCores: keep >= ~4 row tiles so the "parallel" axis shards.
        split_cap = max(sublane, _round_up((N + 3) // 4, sublane))
        tile_m = min(tile_m, split_cap)
    return tile_m, tile_v, v_pad, sublane


def _xent_partial_sums(logits, targets, N, V):
    """Per-row-tile sums of NLL(row) = logsumexp(logits_row) - logits_row[target]."""
    itemsize = jnp.dtype(logits.dtype).itemsize
    tile_m, tile_v, v_pad, sublane = _choose_tiles(N, V, itemsize)
    n_i = pl.cdiv(N, tile_m)        # row tiles ("parallel")
    n_j = v_pad // tile_v           # class tiles ("arbitrary" reduction)
    n_pad = n_i * tile_m

    pad_rows = n_pad - N
    pad_cols = v_pad - V
    if pad_rows or pad_cols:
        # Pad classes with a large finite negative (NOT -inf: an all-padding compare
        # would otherwise hit exp(-inf - -inf) = NaN in the online-softmax rescale).
        logits = jnp.pad(logits, ((0, pad_rows), (0, pad_cols)),
                         constant_values=-1e30)
    if pad_rows:
        targets = jnp.pad(targets, ((0, pad_rows), (0, 0)))

    def kernel(logits_ref, tgt_ref, out_ref, m_ref, l_ref, t_ref):
        i = pl.program_id(0)        # row tile
        j = pl.program_id(1)        # class tile

        @pl.when(j == 0)
        def _():
            m_ref[...] = jnp.full_like(m_ref, -jnp.inf)
            l_ref[...] = jnp.zeros_like(l_ref)
            t_ref[...] = jnp.zeros_like(t_ref)

        logits_b = logits_ref[...].astype(jnp.float32)              # (tile_m, tile_v)
        # Static lane iota + tile-local target: avoids a full-block add per class step.
        col = jax.lax.broadcasted_iota(jnp.int32, (1, tile_v), 1)   # (1, tile_v)
        tgt_local = tgt_ref[...] - j * tile_v                       # (tile_m, 1)
        mask = col == tgt_local                                     # (tile_m, tile_v)

        # Online logsumexp over the class axis.
        m_prev = m_ref[...]
        m_new = jnp.maximum(m_prev, jnp.max(logits_b, axis=-1, keepdims=True))
        alpha = jnp.exp(m_prev - m_new)
        l_ref[...] = alpha * l_ref[...] + jnp.sum(
            jnp.exp(logits_b - m_new), axis=-1, keepdims=True)
        m_ref[...] = m_new
        # Target-logit gather via masked sum (target falls in exactly one class tile).
        t_ref[...] += jnp.sum(
            jnp.where(mask, logits_b, 0.0), axis=-1, keepdims=True)

        @pl.when(j == pl.num_programs(1) - 1)
        def _():
            lse = m_ref[...] + jnp.log(l_ref[...])                   # (tile_m, 1)
            row = i * tile_m + jax.lax.broadcasted_iota(jnp.int32, lse.shape, 0)
            nll = jnp.where(row < N, lse - t_ref[...], 0.0)          # mask padded rows
            out_ref[...] = jnp.full((8, 128), jnp.sum(nll), dtype=jnp.float32)

    # Generation-aware VMEM limit: actual needs + headroom, capped below capacity.
    cap = _vmem_capacity_bytes()
    needed = (2 * tile_m * tile_v * itemsize    # double-buffered logits tiles
              + 2 * tile_m * 4                  # double-buffered targets
              + 2 * 8 * 128 * 4                 # output blocks
              + 3 * tile_m * 4)                 # scratch accumulators
    vmem_limit = max(16 * 1024 * 1024,
                     min(cap - 8 * 1024 * 1024, needed + 16 * 1024 * 1024))

    out = pl.pallas_call(
        kernel,
        out_shape=jax.ShapeDtypeStruct((n_i * 8, 128), jnp.float32),
        grid_spec=pltpu.PrefetchScalarGridSpec(
            num_scalar_prefetch=0,
            grid=(n_i, n_j),
            in_specs=[
                pl.BlockSpec((tile_m, tile_v), lambda i, j: (i, j)),   # logits
                pl.BlockSpec((tile_m, 1), lambda i, j: (i, 0)),        # targets
            ],
            out_specs=pl.BlockSpec((8, 128), lambda i, j: (i, 0)),
            scratch_shapes=[
                pltpu.VMEM((tile_m, 1), jnp.float32),   # running max
                pltpu.VMEM((tile_m, 1), jnp.float32),   # running sum of exp
                pltpu.VMEM((tile_m, 1), jnp.float32),   # accumulated target logit
            ],
        ),
        compiler_params=pltpu.CompilerParams(
            dimension_semantics=("parallel", "arbitrary"),
            vmem_limit_bytes=int(vmem_limit),
        ),
    )(logits, targets)
    # Each (8,128) block is filled with that row tile's partial sum.
    return out.reshape(n_i, 8, 128)[:, 0, 0]                     # (n_i,)


@functools.partial(jax.jit, static_argnames=("kl_weight",))
def custom_loss(reconst, data, mean, logvar, kl_weight=1.0):
    """reconst: (B, S, V) float logits (the torch permute to (B,V,S) is purely
    nn.CrossEntropyLoss's axis convention); data: (B, S) int targets;
    mean/logvar: (B, L).  Returns scalar f32 loss."""
    B, S, V = reconst.shape
    N = B * S
    logits = reconst.reshape(N, V)   # bf16 inputs are fine; kernel upcasts to f32
    targets = data.reshape(N, 1).astype(jnp.int32)

    partials = _xent_partial_sums(logits, targets, N, V)
    xent = jnp.sum(partials) / jnp.float32(N)

    # KL term is O(B*L) — trivial, computed outside the kernel.
    mu = mean.astype(jnp.float32)
    lv = logvar.astype(jnp.float32)
    kl = -0.5 * jnp.sum(1.0 + lv - mu * mu - jnp.exp(lv))
    return xent + jnp.float32(kl_weight) * kl


def _reference_loss(reconst, data, mean, logvar, kl_weight):
    logp = jax.nn.log_softmax(reconst.astype(jnp.float32), axis=-1)   # (B,S,V)
    nll = -jnp.take_along_axis(logp, data[..., None].astype(jnp.int32), axis=-1)
    xent = jnp.mean(nll)
    kl = -0.5 * jnp.sum(1.0 + logvar.astype(jnp.float32)
                        - mean.astype(jnp.float32) ** 2
                        - jnp.exp(logvar.astype(jnp.float32)))
    return xent + kl_weight * kl


if __name__ == "__main__":
    B, S, V, L = 2, 8, 16, 32          # batch, seq, vocab(classes), latent dim
    kl_weight = 0.1

    key = jax.random.PRNGKey(0)
    k1, k2, k3, k4 = jax.random.split(key, 4)
    data = jax.random.randint(k1, (B, S), 0, V, dtype=jnp.int32)
    reconst = jax.random.normal(k2, (B, S, V), dtype=jnp.float32)
    mean = jax.random.normal(k3, (B, L), dtype=jnp.float32)
    logvar = 0.1 * jax.random.normal(k4, (B, L), dtype=jnp.float32)

    loss = jax.block_until_ready(
        custom_loss(reconst, data, mean, logvar, kl_weight=kl_weight))
    ref = _reference_loss(reconst, data, mean, logvar, kl_weight)
    assert jnp.allclose(loss, ref, rtol=1e-5, atol=1e-5), (loss, ref)

    # Exercise the odd-vocab (class-axis padding) + bf16 (16-row sublane) path.
    V2 = 300
    k5, k6 = jax.random.split(k4)
    data2 = jax.random.randint(k5, (B, S), 0, V2, dtype=jnp.int32)
    reconst2 = jax.random.normal(k6, (B, S, V2), dtype=jnp.bfloat16)
    loss2 = jax.block_until_ready(
        custom_loss(reconst2, data2, mean, logvar, kl_weight=kl_weight))
    ref2 = _reference_loss(reconst2, data2, mean, logvar, kl_weight)
    assert jnp.allclose(loss2, ref2, rtol=1e-4, atol=1e-4), (loss2, ref2)

    print("KERNEL_OK")
</pallas_src>

<mosaic_0001>
module attributes {stable_mosaic.version = 11 : i64} {
  func.func @kernel(%arg0: i32, %arg1: i32, %arg2: memref<8x128xf32, #tpu.memory_space<vmem>>, %arg3: memref<8x1xi32, #tpu.memory_space<vmem>>, %arg4: memref<8x128xf32, #tpu.memory_space<vmem>>, %arg5: memref<8x1xf32, #tpu.memory_space<vmem>>, %arg6: memref<8x1xf32, #tpu.memory_space<vmem>>, %arg7: memref<8x1xf32, #tpu.memory_space<vmem>>) attributes {dimension_semantics = [#tpu.dimension_semantics<parallel>, #tpu.dimension_semantics<arbitrary>], iteration_bounds = array<i64: 2, 1>, scalar_prefetch = 0 : i64, scratch_operands = 3 : i64, tpu.core_type = #tpu.core_type<tc>, window_params = [{transform_indices = @transform_0, window_bounds = array<i64: 8, 128>}, {transform_indices = @transform_1, window_bounds = array<i64: 8, 1>}, {transform_indices = @transform_2, window_bounds = array<i64: 8, 128>}]} {
    %c0_i32 = arith.constant 0 : i32
    %0 = arith.cmpi eq, %arg1, %c0_i32 : i32
    %1 = arith.extui %0 : i1 to i32
    %c0_i32_0 = arith.constant 0 : i32
    %2 = arith.cmpi ne, %1, %c0_i32_0 : i32
    scf.if %2 {
      %cst_21 = arith.constant 0xFF800000 : f32
      %38 = vector.broadcast %cst_21 : f32 to vector<8x1xf32>
      %c0_22 = arith.constant 0 : index
      %c0_23 = arith.constant 0 : index
      %39 = vector.load %arg5[%c0_22, %c0_23] : memref<8x1xf32, #tpu.memory_space<vmem>>, vector<8x1xf32>
      tpu.vector_store %arg5[%c0_22, %c0_23], %38 {strides = array<i32>} : memref<8x1xf32, #tpu.memory_space<vmem>>, vector<8x1xf32>,
      %cst_24 = arith.constant 0.000000e+00 : f32
      %40 = vector.broadcast %cst_24 : f32 to vector<8x1xf32>
      %c0_25 = arith.constant 0 : index
      %c0_26 = arith.constant 0 : index
      %41 = vector.load %arg6[%c0_25, %c0_26] : memref<8x1xf32, #tpu.memory_space<vmem>>, vector<8x1xf32>
      tpu.vector_store %arg6[%c0_25, %c0_26], %40 {strides = array<i32>} : memref<8x1xf32, #tpu.memory_space<vmem>>, vector<8x1xf32>,
      %cst_27 = arith.constant 0.000000e+00 : f32
      %42 = vector.broadcast %cst_27 : f32 to vector<8x1xf32>
      %c0_28 = arith.constant 0 : index
      %c0_29 = arith.constant 0 : index
      %43 = vector.load %arg7[%c0_28, %c0_29] : memref<8x1xf32, #tpu.memory_space<vmem>>, vector<8x1xf32>
      tpu.vector_store %arg7[%c0_28, %c0_29], %42 {strides = array<i32>} : memref<8x1xf32, #tpu.memory_space<vmem>>, vector<8x1xf32>,
    } else {
    }
    %c0 = arith.constant 0 : index
    %c0_1 = arith.constant 0 : index
    %3 = vector.load %arg2[%c0, %c0_1] : memref<8x128xf32, #tpu.memory_space<vmem>>, vector<8x128xf32>
    %4 = tpu.iota {dimensions = array<i32: 1>} : vector<1x128xi32>
    %c0_2 = arith.constant 0 : index
    %c0_3 = arith.constant 0 : index
    %5 = vector.load %arg3[%c0_2, %c0_3] : memref<8x1xi32, #tpu.memory_space<vmem>>, vector<8x1xi32>
    %c128_i32 = arith.constant 128 : i32
    %6 = arith.muli %arg1, %c128_i32 : i32
    %7 = vector.broadcast %6 : i32 to vector<8x1xi32>
    %8 = arith.subi %5, %7 : vector<8x1xi32>
    %9 = vector.broadcast %4 : vector<1x128xi32> to vector<8x128xi32>
    %10 = vector.broadcast %8 : vector<8x1xi32> to vector<8x128xi32>
    %11 = arith.cmpi eq, %9, %10 : vector<8x128xi32>
    %c0_4 = arith.constant 0 : index
    %c0_5 = arith.constant 0 : index
    %12 = vector.load %arg5[%c0_4, %c0_5] : memref<8x1xf32, #tpu.memory_space<vmem>>, vector<8x1xf32>
    %cst = arith.constant dense<0xFF800000> : vector<8xf32>
    %13 = vector.multi_reduction <maximumf>, %3, %cst [1] : vector<8x128xf32> to vector<8xf32>
    %14 = vector.shape_cast %13 : vector<8xf32> to vector<8x1xf32>
    %15 = arith.maximumf %12, %14 : vector<8x1xf32>
    %16 = arith.subf %12, %15 : vector<8x1xf32>
    %17 = math.exp %16 : vector<8x1xf32>
    %c0_6 = arith.constant 0 : index
    %c0_7 = arith.constant 0 : index
    %18 = vector.load %arg6[%c0_6, %c0_7] : memref<8x1xf32, #tpu.memory_space<vmem>>, vector<8x1xf32>
    %19 = arith.mulf %17, %18 : vector<8x1xf32>
    %20 = vector.broadcast %15 : vector<8x1xf32> to vector<8x128xf32>
    %21 = arith.subf %3, %20 : vector<8x128xf32>
    %22 = math.exp %21 : vector<8x128xf32>
    %cst_8 = arith.constant dense<0.000000e+00> : vector<8xf32>
    %23 = vector.multi_reduction <add>, %22, %cst_8 [1] : vector<8x128xf32> to vector<8xf32>
    %24 = vector.shape_cast %23 : vector<8xf32> to vector<8x1xf32>
    %25 = arith.addf %19, %24 : vector<8x1xf32>
    %c0_9 = arith.constant 0 : index
    %c0_10 = arith.constant 0 : index
    %26 = vector.load %arg6[%c0_9, %c0_10] : memref<8x1xf32, #tpu.memory_space<vmem>>, vector<8x1xf32>
    tpu.vector_store %arg6[%c0_9, %c0_10], %25 {strides = array<i32>} : memref<8x1xf32, #tpu.memory_space<vmem>>, vector<8x1xf32>,
    %c0_11 = arith.constant 0 : index
    %c0_12 = arith.constant 0 : index
    %27 = vector.load %arg5[%c0_11, %c0_12] : memref<8x1xf32, #tpu.memory_space<vmem>>, vector<8x1xf32>
    tpu.vector_store %arg5[%c0_11, %c0_12], %15 {strides = array<i32>} : memref<8x1xf32, #tpu.memory_space<vmem>>, vector<8x1xf32>,
    %c0_13 = arith.constant 0 : index
    %c0_14 = arith.constant 0 : index
    %28 = vector.load %arg7[%c0_13, %c0_14] : memref<8x1xf32, #tpu.memory_space<vmem>>, vector<8x1xf32>
    %cst_15 = arith.constant 0.000000e+00 : f32
    %29 = vector.broadcast %cst_15 : f32 to vector<8x128xf32>
    %30 = arith.select %11, %3, %29 : vector<8x128xi1>, vector<8x128xf32>
    %cst_16 = arith.constant dense<0.000000e+00> : vector<8xf32>
    %31 = vector.multi_reduction <add>, %30, %cst_16 [1] : vector<8x128xf32> to vector<8xf32>
    %32 = vector.shape_cast %31 : vector<8xf32> to vector<8x1xf32>
    %33 = arith.addf %28, %32 : vector<8x1xf32>
    %c0_17 = arith.constant 0 : index
    %c0_18 = arith.constant 0 : index
    %34 = vector.load %arg7[%c0_17, %c0_18] : memref<8x1xf32, #tpu.memory_space<vmem>>, vector<8x1xf32>
    tpu.vector_store %arg7[%c0_17, %c0_18], %33 {strides = array<i32>} : memref<8x1xf32, #tpu.memory_space<vmem>>, vector<8x1xf32>,
    %c0_i32_19 = arith.constant 0 : i32
    %35 = arith.cmpi eq, %arg1, %c0_i32_19 : i32
    %36 = arith.extui %35 : i1 to i32
    %c0_i32_20 = arith.constant 0 : i32
    %37 = arith.cmpi ne, %36, %c0_i32_20 : i32
    scf.if %37 {
      %c0_21 = arith.constant 0 : index
      %c0_22 = arith.constant 0 : index
      %38 = vector.load %arg5[%c0_21, %c0_22] : memref<8x1xf32, #tpu.memory_space<vmem>>, vector<8x1xf32>
      %c0_23 = arith.constant 0 : index
      %c0_24 = arith.constant 0 : index
      %39 = vector.load %arg6[%c0_23, %c0_24] : memref<8x1xf32, #tpu.memory_space<vmem>>, vector<8x1xf32>
      %40 = math.log %39 : vector<8x1xf32>
      %41 = arith.addf %38, %40 : vector<8x1xf32>
      %c8_i32 = arith.constant 8 : i32
      %42 = arith.muli %arg0, %c8_i32 : i32
      %43 = tpu.iota {dimensions = array<i32: 0>} : vector<8x1xi32>
      %44 = vector.broadcast %42 : i32 to vector<8x1xi32>
      %45 = arith.addi %44, %43 : vector<8x1xi32>
      %c16_i32 = arith.constant 16 : i32
      %46 = vector.broadcast %c16_i32 : i32 to vector<8x1xi32>
      %47 = arith.cmpi slt, %45, %46 : vector<8x1xi32>
      %c0_25 = arith.constant 0 : index
      %c0_26 = arith.constant 0 : index
      %48 = vector.load %arg7[%c0_25, %c0_26] : memref<8x1xf32, #tpu.memory_space<vmem>>, vector<8x1xf32>
      %49 = arith.subf %41, %48 : vector<8x1xf32>
      %cst_27 = arith.constant 0.000000e+00 : f32
      %50 = vector.broadcast %cst_27 : f32 to vector<8x1xf32>
      %51 = arith.select %47, %49, %50 : vector<8x1xi1>, vector<8x1xf32>
      %52 = vector.shape_cast %51 : vector<8x1xf32> to vector<1x8x1xf32>
      %cst_28 = arith.constant dense<0.000000e+00> : vector<1xf32>
      %53 = vector.multi_reduction <add>, %52, %cst_28 [1, 2] : vector<1x8x1xf32> to vector<1xf32>
      %54 = vector.shape_cast %53 : vector<1xf32> to vector<1x1x1xf32>
      %55 = vector.extract %54[0, 0, 0] : f32 from vector<1x1x1xf32>
      %56 = vector.broadcast %55 : f32 to vector<8x128xf32>
      %c0_29 = arith.constant 0 : index
      %c0_30 = arith.constant 0 : index
      %57 = vector.load %arg4[%c0_29, %c0_30] : memref<8x128xf32, #tpu.memory_space<vmem>>, vector<8x128xf32>
      tpu.vector_store %arg4[%c0_29, %c0_30], %56 {strides = array<i32>} : memref<8x128xf32, #tpu.memory_space<vmem>>, vector<8x128xf32>,
    } else {
    }
    return
  }
  func.func @transform_0(%arg0: i32, %arg1: i32) -> (i32, i32) {
    %c0_i32 = arith.constant 0 : i32
    return %arg0, %arg1 : i32, i32
  }
  func.func @transform_1(%arg0: i32, %arg1: i32) -> (i32, i32) {
    %c0_i32 = arith.constant 0 : i32
    %c0_i32_0 = arith.constant 0 : i32
    return %arg0, %c0_i32 : i32, i32
  }
  func.func @transform_2(%arg0: i32, %arg1: i32) -> (i32, i32) {
    %c0_i32 = arith.constant 0 : i32
    %c0_i32_0 = arith.constant 0 : i32
    return %arg0, %c0_i32 : i32, i32
  }
}

</mosaic_0001>

<bundles_post_ra>
// kernel: custom_loss.1
= control target key start
LH: loop header
LB: loop body
LE: loop exit
PB: predicated region body
PF: predicated region fallthrough
CT: control target
= control target key end

     0   :  { %s422_s9 = smov 0   ;;  %s424_s10 = smov 0   ;;  %s475_s0 = inlined_call_operand.vmem [shape: f32[16,128], index: 0, kind: input, shape index: {}]   ;;  %s476_s1 = inlined_call_operand.vmem [shape: s32[16,1], index: 1, kind: input, shape index: {}]   ;;  %s477_s2 = inlined_call_operand.vmem [shape: f32[16,128], index: 2, kind: output, shape index: {}]  }
   0x1   :  { %s426_s11 = smov 0  }
   0x2 LB: > { %s24_s12 = sadd.s32 1, %s398_s10  ;;  %p336_p0 = scmp.ge.s32.totalorder %s402_s11, 1  ;;  %s402_s11 = sphi %s426_s11, %s12_s11   ;;  %s398_s10 = sphi %s424_s10, %s479_s10   ;;  %s394_s9 = sphi %s422_s9, %s478_s9  }
   0x3   : > { %p26_p1 = scmp.ge.s32.totalorder %s24_s12, 2  ;;  %p137_p2 = scmp.lt.s32.totalorder %s402_s11, 3 }
   0x5   : > { %s481_s12 = smov (%p26_p1, %s24_s12), 0  ;;  %p138_p3 = pnand %p336_p0, %p137_p2 }
   0x6   : > { %p164_p4 = scmp.lt.s32.totalorder (!%p138_p3), %s394_s9, 1  ;;  %s340_s21 = sshll.u32 (!%p138_p3), %s394_s9, 3 }
   0x7   : > { %141 = sbr.rel (%p138_p3) target bundleno = 671 (0x29f), region = 28 }
   0xc   : > { %vm183_vm0 = vcmask 7168   ;;  %v404_v0 = vmov -inf   ;;  %s165_s13 = scalar_select %p164_p4, %s394_s9, 1  ;;  %v405_v2 = vmov 0   ;;  %v406_v4 = vmov 0.0  }
   0xd   : > { %184 = vst.msk [vmem:[#allocation2] sm:$0xff] %vm183_vm0, %v404_v0  ;;  %372 = vset.pattern.permute.xlu0 %v405_v2  ;;  %373 = vset.pattern.permute.xlu1 %v405_v2  ;;  %185 = vst.msk [vmem:[#allocation3] sm:$0xff] %vm183_vm0, %v406_v4  ;;  %v188_v12 = vlaneseq  ;;  %v238_v28 = vstv %s340_s21 }
   0xe   : > { %s445_s14 = sshll.u32 %s165_s13, 3  ;;  %186 = vst.msk [vmem:[#allocation4] sm:$0xff] %vm183_vm0, %v406_v4 }
   0xf   : > { %s170_s17 = scalar_lea.vmem %s475_s0, %s445_s14  ;;  %s174_s20 = scalar_lea.vmem %s476_s1, %s445_s14  ;;  %v189_v13 = vand.u32 127, %v188_v12  ;;  %v237_v27 = vshrl.u32 %v188_v12, 7 }
  0x10   : > { %v187_v1 = vld [vmem:[%s170_s17] sm:$0xff]  ;;  %s178_s24 = scalar_lea.vmem %s477_s2, %s445_s14 }
  0x11   : > { %199 = vmax.xlane.f32.xlu0 %v187_v1  ;;  %v190_v3 = vld [vmem:[%s174_s20] sm:$0xff]  ;;  %v239_v30 = vadd.s32 %v238_v28, %v237_v27 }
  0x12   : > { %195 = vperm.xlu1 %373, %v190_v3  }
  0x13   : > { %vm240_vm2 = vcmp.lt.s32.totalorder %v239_v30, 16 }
  0x14   : > { %v198_v5 = vld [vmem:[#allocation2] sm:$0xff]  ;;  %v205_v19 = vld [vmem:[#allocation3] sm:$0xff] }
  0x15   : > { %v221_v23 = vld [vmem:[#allocation4] sm:$0xff] }
  0x8d   : > { %v196_v14 = vpop.permute.xlu1 %195 }
  0x8e   : > { %vm197_vm1 = vcmp.eq.s32.totalorder %v189_v13, %v196_v14 }
  0x8f   : > { %v222_v16 = vsel %vm197_vm1, %v187_v1, 0.0 }
  0x9a   : > { %v200_v6 = vpop.xlane.xlu0 %199 }
  0x9b   : > { %v201_v7 = vmax.f32 %v198_v5, %v200_v6 }
  0x9d   : > { %v202_v8 = vsub.f32 %v198_v5, %v201_v7  ;;  %220 = vst.msk [vmem:[#allocation2] sm:$0xff] %vm183_vm0, %v201_v7  ;;  %209 = vperm.xlu0 %372, %v201_v7  }
  0x9f   : > { %v203_v17 = vmul.f32 1.442695, %v202_v8 }
  0xa4   : > { %v230_v32 = vld [vmem:[#allocation2] sm:$0xff] }
 0x118   : > { %v210_v9 = vpop.permute.xlu0 %209 }
 0x119   : > { %v212_v10 = vsub.f32 %v187_v1, %v210_v9 }
 0x11b   : > { %v213_v11 = vmul.f32 1.442695, %v212_v10 }
 0x11d   : > { %374 = vpow2.f32 %v213_v11 }
 0x11e   : > { %376 = vpow2.f32 %v203_v17 }
 0x12a   : > { %v375_v15 = vpop.eup %374 }
 0x12b   : > { %215 = vadd.xlane.f32.xlu1 %v375_v15  ;;  %v377_v18 = vpop.eup %376 }
 0x12c   : > { %v206_v20 = vmul.f32 %v377_v18, %v205_v19 }
 0x12f   : > { %223 = vadd.xlane.f32.xlu1 %v222_v16 }
 0x1b4   : > { %v216_v21 = vpop.xlane.xlu1 %215 }
 0x1b5   : > { %v217_v22 = vadd.f32 %v216_v21, %v206_v20 }
 0x1b7   : > { %219 = vst.msk [vmem:[#allocation3] sm:$0xff] %vm183_vm0, %v217_v22 }
 0x1b8   : > { %v224_v24 = vpop.xlane.xlu1 %223 }
 0x1b9   : > { %v225_v25 = vadd.f32 %v224_v24, %v221_v23 }
 0x1bb   : > { %226 = vst.msk [vmem:[#allocation4] sm:$0xff] %vm183_vm0, %v225_v25 }
 0x1be   : > { %v231_v26 = vld [vmem:[#allocation3] sm:$0xff] }
 0x1bf   : > { %378 = vlog2.f32 %v231_v26 }
 0x1c2   : > { %v241_v33 = vld [vmem:[#allocation4] sm:$0xff] }
 0x1cc   : > { %v379_v29 = vpop.eup %378 }
 0x1cd   : > { %v233_v31 = vmul.f32 0.6931472, %v379_v29 }
 0x1cf   : > { %v234_v34 = vadd.f32 %v233_v31, %v230_v32 }
 0x1d1   : > { %v242_v35 = vsub.f32 %v234_v34, %v241_v33 }
 0x1d3   : > { %v243_v36 = vsel %vm240_vm2, %v242_v35, 0.0 }
 0x1d4   : > { %v244_v37 = vsel %vm183_vm0, %v243_v36, 0.0 }
 0x1d5   : > { %245 = vadd.xlane.f32.xlu1 %v244_v37 }
 0x25e   : > { %v246_v38 = vpop.xlane.xlu1 %245 }
 0x25f   : > { %v247_v39 = vrot.slane %v246_v38, 4 }
 0x261   : > { %v248_v40 = vadd.f32 %v247_v39, %v246_v38 }
 0x263   : > { %v249_v41 = vrot.slane %v248_v40, 2 }
 0x265   : > { %v250_v42 = vadd.f32 %v249_v41, %v248_v40 }
 0x267   : > { %v251_v43 = vrot.slane %v250_v42, 1 }
 0x269   : > { %v252_v44 = vadd.f32 %v251_v43, %v250_v42 }
 0x26b   : > { %343 = vpush %v252_v44 }
 0x29c   : > { %s344_s25 = spop %343 }
 0x29d   : > { %v254_v45 = vstv %s344_s25 }
 0x29e   : > { %255 = vst [vmem:[%s178_s24] sm:$0xff] %v254_v45 }
 0x29f PF: > { %s12_s11 = sadd.s32 1, %s402_s11   ;;  %s478_s9 = smov %s398_s10 }
 0x2a0   : > { %p9_p5 = scmp.ge.s32.totalorder %s12_s11, 4   ;;  %s479_s10 = smov %s481_s12 }
 0x2a2   :  { %11 = sbr.rel (!%p9_p5) target bundleno = 2 (0x2), region = 69 }

</bundles_post_ra>
